<compile_context>
chip_gen: v7x
topology: tpu7x:2x2x1
jax: 0.10.0
libtpu: 0.0.40
codegen_flags: <defaults>
</compile_context>

<pallas_src>
import functools

import jax
import jax.numpy as jnp
from jax.experimental import pallas as pl
from jax.experimental.pallas import tpu as pltpu


def _round_up(x, m):
    return ((x + m - 1) // m) * m


def _vmem_capacity_bytes():
    # Per-TensorCore VMEM: 128 MiB on v5e/v6e, 64 MiB on v7x.  Fall back to the
    # conservative v7x number if the query is unavailable.
    try:
        return int(pltpu.get_tpu_info().vmem_capacity_bytes)
    except Exception:
        return 64 << 20


def _choose_tile_m(M, tile_m):
    """Pick the M tile: multiple of 16 (bf16 sublane packing), <= tile_m,
    grid_m >= 2 (>= 4 when M allows) so v7x's two TensorCores both get work
    over the "parallel" M axis, preferring an exact divisor of M so there is
    no partial final block."""
    if M <= 16:
        return M
    tm = min(_round_up(tile_m, 16), (M // 16) * 16)
    min_grid = 4 if M >= 64 else 2
    while tm > 16 and pl.cdiv(M, tm) < min_grid:
        tm = max(16, _round_up(tm // 2, 16))
    # Prefer a nearby exact divisor of M (keeps the tile large; avoids a
    # masked partial final block).
    cand = tm
    while cand >= max(tm - 64, 16):
        if M % cand == 0:
            return cand
        cand -= 16
    return tm


def _patch_embed_kernel(x_ref, w_ref, b_ref, o_ref):
    # x_ref: (TM, Kp) bf16 patch tile
    # w_ref: (Kp, N)  bf16 projection weight (constant block index -> resident)
    # b_ref: (1, N)   f32 bias (resident)
    # o_ref: (TM, N)  output tile
    acc = jnp.dot(x_ref[...], w_ref[...], preferred_element_type=jnp.float32)
    o_ref[...] = (acc + b_ref[...]).astype(o_ref.dtype)


def patch_embed(x, weight, bias, patch_size, *, tile_m=512,
                out_dtype=jnp.bfloat16):
    """ViT patch embedding.

    x: (B, C, H, W); weight: (E, C, P, P); bias: (E,) -> (B, n_patches, E).
    out_dtype defaults to bf16 (typical downstream transformer dtype); pass
    x.dtype for exact dtype parity with the PyTorch module.
    """
    B, C, H, W = x.shape
    E = weight.shape[0]
    P = patch_size
    Hp, Wp = H // P, W // P
    n_patches = Hp * Wp
    K = C * P * P
    M = B * n_patches

    # Lane padding.  K=768 and E in {768, 1024, 1280} need nothing, so at real
    # ViT shapes there is no padding and no trailing slice.  (Padding N to 256
    # instead of 128 would fill the v6e/v7x 2x256 MXU slightly better, but it
    # reintroduces an output-slice HBM pass, so we only pad non-aligned E.)
    Kp = _round_up(max(K, 1), 128)
    N = E if E % 128 == 0 else _round_up(E, 128)

    # --- patchify + bf16 cast + K-pad: one fused XLA pass over activations ---
    # Inner patch order is (C, ph, pw), matching the Conv2d weight layout.
    xp = x.reshape(B, C, Hp, P, Wp, P)
    xp = xp.transpose(0, 2, 4, 1, 3, 5)                   # (B, Hp, Wp, C, P, P)
    xp = xp.reshape(M, K).astype(jnp.bfloat16)
    if Kp != K:
        xp = jnp.pad(xp, ((0, 0), (0, Kp - K)))

    # Weight / bias prep (tiny, one-shot; hoist to param init in production).
    w2d = weight.reshape(E, K).T.astype(jnp.bfloat16)     # (K, E)
    b1d = bias.astype(jnp.float32)
    if Kp != K:
        w2d = jnp.pad(w2d, ((0, Kp - K), (0, 0)))
    if N != E:
        w2d = jnp.pad(w2d, ((0, 0), (0, N - E)))
        b1d = jnp.pad(b1d, (0, N - E))
    b2d = b1d.reshape(1, N)

    TM = _choose_tile_m(M, tile_m)
    grid_m = pl.cdiv(M, TM)
    out_itemsize = jnp.dtype(out_dtype).itemsize

    # Per-step VMEM footprint (double-buffered pipeline buffers) + headroom,
    # capped at ~75% of this generation's per-core VMEM capacity.
    vmem_est = (2 * TM * Kp * 2          # x tile, bf16
                + 2 * Kp * N * 2         # weight, bf16 (fetched once)
                + 2 * N * 4              # bias, f32
                + 2 * TM * N * out_itemsize)
    vmem_limit = int(min(vmem_est + (8 << 20),
                         (_vmem_capacity_bytes() * 3) // 4))

    cost = pl.CostEstimate(
        flops=2 * M * Kp * N,
        transcendentals=0,
        bytes_accessed=(M * Kp * 2 + Kp * N * 2 + N * 4 + M * N * out_itemsize),
    )

    out = pl.pallas_call(
        _patch_embed_kernel,
        out_shape=jax.ShapeDtypeStruct((M, N), out_dtype),
        grid_spec=pltpu.PrefetchScalarGridSpec(
            num_scalar_prefetch=0,
            grid=(grid_m,),
            in_specs=[
                pl.BlockSpec((TM, Kp), lambda i: (i, 0)),   # patch tile
                # Weight / bias have constant block indices -> DMA'd once and
                # kept resident.  (Could be single-buffered via pl.Buffered(1)
                # to halve their VMEM if tiles ever grow near the limit.)
                pl.BlockSpec((Kp, N), lambda i: (0, 0)),
                pl.BlockSpec((1, N), lambda i: (0, 0)),
            ],
            out_specs=pl.BlockSpec((TM, N), lambda i: (i, 0)),
        ),
        compiler_params=pltpu.CompilerParams(
            dimension_semantics=("parallel",),
            vmem_limit_bytes=vmem_limit,
        ),
        cost_estimate=cost,
    )(xp, w2d, b2d)

    if N != E:
        out = out[:, :E]
    return out.reshape(B, n_patches, E)


if __name__ == "__main__":
    # Small shapes: img_size=16, patch_size=4, in_chans=4, embed_dim=32, batch=2
    B, C, H, W = 2, 4, 16, 16
    P = 4
    E = 32

    key = jax.random.PRNGKey(0)
    kx, kw, kb = jax.random.split(key, 3)
    x = jax.random.normal(kx, (B, C, H, W), dtype=jnp.float32)
    weight = jax.random.normal(kw, (E, C, P, P), dtype=jnp.float32) * 0.02
    bias = jax.random.normal(kb, (E,), dtype=jnp.float32) * 0.02

    # jit the wrapper so the patchify transpose + bf16 cast + pad fuse into a
    # single XLA pass feeding the Pallas call.
    fn = jax.jit(functools.partial(patch_embed, patch_size=P))
    out = jax.block_until_ready(fn(x, weight, bias))

    # Pure-JAX f32 reference: conv2d (stride = kernel = P), flatten, transpose.
    ref = jax.lax.conv_general_dilated(
        x, weight, window_strides=(P, P), padding="VALID",
        dimension_numbers=("NCHW", "OIHW", "NCHW"),
    ) + bias.reshape(1, E, 1, 1)
    ref = ref.reshape(B, E, -1).transpose(0, 2, 1)

    assert out.shape == (B, (H // P) * (W // P), E), out.shape
    assert out.dtype == jnp.bfloat16, out.dtype
    err = float(jnp.max(jnp.abs(out.astype(jnp.float32) - ref)))
    # bf16 MXU inputs, f32 accumulation, bf16 output -> bf16-level tolerance.
    assert err < 2e-2, err
    print("KERNEL_OK")
</pallas_src>

<mosaic_0001>
module attributes {stable_mosaic.version = 11 : i64} {
  func.func @_patch_embed_kernel(%arg0: i32, %arg1: memref<16x128xbf16, #tpu.memory_space<vmem>>, %arg2: memref<128x128xbf16, #tpu.memory_space<vmem>>, %arg3: memref<1x128xf32, #tpu.memory_space<vmem>>, %arg4: memref<16x128xbf16, #tpu.memory_space<vmem>>) attributes {dimension_semantics = [#tpu.dimension_semantics<parallel>], iteration_bounds = array<i64: 2>, scalar_prefetch = 0 : i64, scratch_operands = 0 : i64, tpu.core_type = #tpu.core_type<tc>, window_params = [{transform_indices = @transform_0, window_bounds = array<i64: 16, 128>}, {pipeline_mode = #tpu.pipeline_mode<synchronous>, transform_indices = @transform_1, window_bounds = array<i64: 128, 128>}, {pipeline_mode = #tpu.pipeline_mode<synchronous>, transform_indices = @transform_2, window_bounds = array<i64: 1, 128>}, {transform_indices = @transform_3, window_bounds = array<i64: 16, 128>}]} {
    %c0 = arith.constant 0 : index
    %c0_0 = arith.constant 0 : index
    %0 = vector.load %arg1[%c0, %c0_0] : memref<16x128xbf16, #tpu.memory_space<vmem>>, vector<16x128xbf16>
    %c0_1 = arith.constant 0 : index
    %c0_2 = arith.constant 0 : index
    %1 = vector.load %arg2[%c0_1, %c0_2] : memref<128x128xbf16, #tpu.memory_space<vmem>>, vector<128x128xbf16>
    %cst = arith.constant dense<0.000000e+00> : vector<16x128xf32>
    %2 = tpu.matmul %0, %1, %cst {dimension_numbers = #tpu.dot_dimension_numbers<[1], [0], [0], [1], [0, 0, 1, 1], [], []>} : vector<16x128xbf16>, vector<128x128xbf16>, vector<16x128xf32> -> vector<16x128xf32>
    %c0_3 = arith.constant 0 : index
    %c0_4 = arith.constant 0 : index
    %3 = vector.load %arg3[%c0_3, %c0_4] : memref<1x128xf32, #tpu.memory_space<vmem>>, vector<1x128xf32>
    %4 = vector.broadcast %3 : vector<1x128xf32> to vector<16x128xf32>
    %5 = arith.addf %2, %4 : vector<16x128xf32>
    %6 = arith.truncf %5 : vector<16x128xf32> to vector<16x128xbf16>
    %c0_5 = arith.constant 0 : index
    %c0_6 = arith.constant 0 : index
    %7 = vector.load %arg4[%c0_5, %c0_6] : memref<16x128xbf16, #tpu.memory_space<vmem>>, vector<16x128xbf16>
    tpu.vector_store %arg4[%c0_5, %c0_6], %6 {strides = array<i32>} : memref<16x128xbf16, #tpu.memory_space<vmem>>, vector<16x128xbf16>,
    return
  }
  func.func @transform_0(%arg0: i32) -> (i32, i32) {
    %c0_i32 = arith.constant 0 : i32
    %c0_i32_0 = arith.constant 0 : i32
    return %arg0, %c0_i32 : i32, i32
  }
  func.func @transform_1(%arg0: i32) -> (i32, i32) {
    %c0_i32 = arith.constant 0 : i32
    %c0_i32_0 = arith.constant 0 : i32
    %c0_i32_1 = arith.constant 0 : i32
    return %c0_i32, %c0_i32_0 : i32, i32
  }
  func.func @transform_2(%arg0: i32) -> (i32, i32) {
    %c0_i32 = arith.constant 0 : i32
    %c0_i32_0 = arith.constant 0 : i32
    %c0_i32_1 = arith.constant 0 : i32
    return %c0_i32, %c0_i32_0 : i32, i32
  }
  func.func @transform_3(%arg0: i32) -> (i32, i32) {
    %c0_i32 = arith.constant 0 : i32
    %c0_i32_0 = arith.constant 0 : i32
    return %arg0, %c0_i32 : i32, i32
  }
}

</mosaic_0001>

<bundles_post_ra>
// kernel: patch_embed.1
= control target key start
LH: loop header
LB: loop body
LE: loop exit
PB: predicated region body
PF: predicated region fallthrough
CT: control target
= control target key end

     0   :  { %8 = vsyncpa [#allocation3], 0  ;;  %s710_s0 = inlined_call_operand.vmem [shape: bf16[32,128], index: 0, kind: input, shape index: {}]   ;;  %s711_s1 = inlined_call_operand.vmem [shape: bf16[128,128], index: 1, kind: input, shape index: {}]   ;;  %s712_s2 = inlined_call_operand.vmem [shape: f32[1,128], index: 2, kind: input, shape index: {}]   ;;  %s713_s3 = inlined_call_operand.hbm [shape: bf16[32,128], index: 3, kind: output, shape index: {}]  }
   0x1   :  { %10 = vsyncpa [#allocation3 + $0x1], 0  ;;  %s581_s12 = smov 0   ;;  %s583_s13 = smov 0  }
   0x2   :  { %s585_s14 = smov 0   ;;  %s587_s15 = smov 0  }
   0x3 LB: > { %s602_s16 = sadd.s32 4294967295, %s554_s15   ;;  %s379_s17 = sadd.s32 4294967294, %s554_s15   ;;  %s554_s15 = sphi %s587_s15, %s719_s15   ;;  %s550_s14 = sphi %s585_s14, %s718_s14   ;;  %s546_s13 = sphi %s583_s13, %s717_s13   ;;  %s542_s12 = sphi %s581_s12, %s716_s12  }
   0x4   : > { %s606_s18 = sadd.s32 1, %s554_s15   ;;  %s91_s19 = sadd.s32 1, %s550_s14 }
   0x5   : > { %s88_s20 = ssub.s32 %s554_s15, %s606_s18  ;;  %p101_p0 = scmp.ne.s32.totalorder %s550_s14, %s546_s13 }
   0x6   : > { %p89_p1 = scmp.eq.s32.totalorder %s88_s20, 0  ;;  %p102_p2 = scmp.eq.s32.totalorder %s602_s16, 1 }
   0x7   : > { %p107_p3 = scmp.ne.s32.totalorder %s546_s13, %s542_s12  ;;  %p108_p4 = scmp.eq.s32.totalorder %s379_s17, 1 }
   0x8   : > { %s617_s21 = scalar_select %p89_p1, %s550_s14, %s91_s19  }
   0x9   : > { %p619_p5 = por %p102_p2, %p101_p0  ;;  %p623_p6 = por %p108_p4, %p107_p3 }
   0xa   : > { %p382_p7 = scmp.ge.s32.totalorder %s554_s15, 1  ;;  %p141_p8 = scmp.lt.s32.totalorder %s554_s15, 3 }
   0xc   : > { %p142_p9 = pnand %p382_p7, %p141_p8 }
   0xd   : > { %v483_v0 = vld [vmem:[%s711_s1] sm:$0xff] (!%p142_p9)   ;;  %v556_v1 = vmov (!%p142_p9), 0.0   ;;  %v484_v2 = vld [vmem:[%s711_s1 + $0x8] sm:$0xff] (!%p142_p9)   ;;  %vm557_vm0 = vmmov (!%p142_p9), 0   ;;  %s384_s28 = sshll.u32 (!%p142_p9), %s602_s16, 1  ;;  %v485_v3 = vld [vmem:[%s711_s1 + $0x10] sm:$0xff] (!%p142_p9)  }
   0xe   : > { %145 = sbr.rel (%p142_p9) target bundleno = 279 (0x117), region = 32  ;;  %420 = vmatprep.subr.bf16.mxu0 (!%p142_p9), %v556_v1  ;;  %436 = vmatprep.mubr.msk.bf16.mxu0 (!%p142_p9), %vm557_vm0, %v556_v1  ;;  %p166_p10 = scmp.lt.s32.totalorder (!%p142_p9), %s384_s28, 3  ;;  %v486_v4 = vld [vmem:[%s711_s1 + $0x18] sm:$0xff] (!%p142_p9)   ;;  %v487_v5 = vld [vmem:[%s711_s1 + $0x20] sm:$0xff] (!%p142_p9)   ;;  %v488_v6 = vld [vmem:[%s711_s1 + $0x28] sm:$0xff] (!%p142_p9)  }
   0xf   : > { %421 = vmatpush3.bf16.msra.mxu0 (!%p142_p9), %v483_v0  ;;  %v489_v7 = vld [vmem:[%s711_s1 + $0x30] sm:$0xff] (!%p142_p9)   ;;  %v490_v8 = vld [vmem:[%s711_s1 + $0x38] sm:$0xff] (!%p142_p9)   ;;  %s162_s27 = sand.u32 (!%p142_p9), 1, %s546_s13   ;;  %v386_v10 = vld [vmem:[%s712_s2] ss:$0 sm:$0xff] (!%p142_p9)  ;;  %s405_s6 = sshll.u32 (!%p142_p9), %s602_s16, 7 }
  0x10   : > { %422 = vmatprep.subr.bf16.mxu0 (!%p142_p9), %v556_v1  ;;  %s667_s9 = scalar_lea.hbm (!%p142_p9), %s713_s3, %s405_s6  ;;  %s669_s10 = scalar_lea.sflag (!%p142_p9), [#allocation3], %s162_s27 }
  0x11   : > { %s558_s16 = smov (!%p142_p9), [#allocation2]  }
  0x12   : > { %s496_s17 = sshll.u32 (!%p142_p9), %s558_s16, 4  ;;  %s497_s17 = int_to_ptr.vmem [resolvable:$false] %s496_s17 }
  0x13   : > { %423 = vmatpush3.bf16.msra.mxu0 (!%p142_p9), %v484_v2  ;;  %s498_s19 = scalar_lea.vmem (!%p142_p9), %s497_s17, 256 }
  0x14   : > { %424 = vmatprep.subr.bf16.mxu0 (!%p142_p9), %v556_v1 }
  0x15   : > { %s721_s28 = smov (!%p166_p10, %s384_s28), 3 }
  0x16   : > { %s385_s4 = sshll.u32 %s721_s28, 2  ;;  %s383_s28 = sshll.u32 %s162_s27, 3 }
  0x17   : > { %s169_s7 = scalar_lea.vmem %s710_s0, %s385_s4  ;;  %425 = vmatpush3.bf16.msra.mxu0 %v485_v3  ;;  %s164_s4 = scalar_lea.vmem [#allocation2], %s383_s28 }
  0x18   : > { %426 = vmatprep.subr.bf16.mxu0 %v556_v1  ;;  %v491_v9 = vld [vmem:[%s169_s7] sm:$0xff]   ;;  %s317_s5 = sshll.u32 %s164_s4, 4  ;;  %s662_s5 = int_to_ptr.vmem [resolvable:$true] %s317_s5 }
  0x19   : > { %s492_s11 = scalar_lea.vmem %s662_s5, 128  ;;  %p499_p0 = scmp.lt.s32.totalorder %s662_s5, %s497_s17 }
  0x1a   : > { %p493_p11 = scmp.ne.s32.totalorder %s662_s5, %s492_s11  ;;  %p500_p1 = scmp.lt.s32.totalorder %s498_s19, %s492_s11 }
  0x1b   : > { %427 = vmatpush3.bf16.msra.mxu0 %v486_v4 }
  0x1c   : > { %428 = vmatprep.subr.bf16.mxu0 %v556_v1  ;;  %p494_p12 = pnand %p493_p11, %p619_p5  ;;  %p501_p2 = por %p500_p1, %p499_p0 }
  0x1e   : > { %p495_p13 = pneg %p494_p12 }
  0x1f   : > { %429 = vmatpush3.bf16.msra.mxu0 %v487_v5 }
  0x20   : > { %430 = vmatprep.subr.bf16.mxu0 %v556_v1  ;;  %p502_p3 = pnand %p501_p2, %p495_p13 }
  0x23   : > { %431 = vmatpush3.bf16.msra.mxu0 %v488_v6 }
  0x24   : > { %432 = vmatprep.subr.bf16.mxu0 %v556_v1 }
  0x27   : > { %433 = vmatpush3.bf16.msra.mxu0 %v489_v7 }
  0x28   : > { %434 = vmatprep.subr.bf16.mxu0 %v556_v1 }
  0x2b   : > { %435 = vmatpush3.bf16.msra.mxu0 %v490_v8 }
  0x2e   : > { %437 = vmatmul.mubr.bf16.vlgmr.msra.gmra.mrb[0].mxu0 %v491_v9 }
 0x101   : > { %v286_v11 = vpop.f32.mrb[0].mxu0 }
 0x102   : > { %v438_v12 = vpop.f32.mrb[1].mxu0  ;;  %v287_v14 = vadd.f32 %v386_v10, %v286_v11 }
 0x103   : > { %v289_v13 = vpop.f32.mrb[2].mxu0 }
 0x104   : > { %v290_v15 = vadd.f32 %v386_v10, %v289_v13  ;;  %v439_v16 = vpop.f32.mrb[3].mxu0 }
 0x106   : > { %v409_v17 = vpack.c.bf16 %v290_v15, %v287_v14 }
 0x108   : > { %410 = vst [vmem:[%s164_s4] sm:$0xff] %v409_v17  }
 0x109   : > { %505 = shalt.err (!%p502_p3)
}
 0x10a   : > { %s506_s20 = scalar_lea.hbm %s667_s9, 128  ;;  %s510_s26 = scalar_lea.hbm %s713_s3, 256 }
 0x10b   : > { %p507_p4 = scmp.ne.s32.totalorder %s667_s9, %s506_s20  ;;  %p511_p9 = scmp.lt.u32.totalorder %s667_s9, %s713_s3 }
 0x10c   : > { %p512_p10 = scmp.lt.u32.totalorder %s510_s26, %s506_s20  ;;  %p514_p12 = scmp.lt.u32.totalorder %s506_s20, %s667_s9 }
 0x10d   : > { %p508_p7 = pnand %p507_p4, %p619_p5 }
 0x10e   : > { %p513_p11 = por %p512_p10, %p511_p9 }
 0x10f   : > { %p509_p8 = pneg %p508_p7 }
 0x110   : > { %p515_p13 = por %p514_p12, %p513_p11 }
 0x112   : > { %p516_p0 = pnand %p515_p13, %p509_p8 }
 0x114   : > { %519 = shalt.err (!%p516_p0)
}
 0x115   : > { %s559_s29 = smov 64   ;;  %s560_s30 = smov 4  }
 0x116   : > { %440 = dma.vmem_to_hbm [thread:$0]  (%p619_p5), %s662_s5, 128, %s667_s9, %s669_s10, %s559_s29, %s559_s29, %s560_s30  }
 0x117 PF: > { %p446_p1 = scmp.ge.s32.totalorder %s554_s15, 2  ;;  %s332_s4 = sand.u32 1, %s542_s12  }
 0x118   : > { %s333_s6 = scalar_lea.sflag [#allocation3], %s332_s4 }
 0x119   : > { %p443_p2 = pnand %p446_p1, %p623_p6 }
 0x11b   : > { %537 = dma.done.wait (!%p443_p2), %s333_s6, 128  }
 0x11c   : > { %539 = vsyncadd (!%p443_p2), %s333_s6, 4294967168  ;;  %p13_p3 = scmp.ge.s32.totalorder %s606_s18, 4   ;;  %s716_s12 = smov %s546_s13 }
 0x11d   : > { %s717_s13 = smov %s550_s14  ;;  %s718_s14 = smov %s617_s21 }
 0x11e   : > { %s719_s15 = smov %s606_s18  ;;  %15 = sbr.rel (!%p13_p3) target bundleno = 3 (0x3), region = 67 }
 0x125   :  { %338 = vsyncpa [#allocation3], 1 }
 0x126   :  { %340 = vsyncpa [#allocation3 + $0x1], 1 }

</bundles_post_ra>
